<compile_context>
chip_gen: v7x
topology: tpu7x:2x2x1
jax: 0.10.0
libtpu: 0.0.40
codegen_flags: <defaults>
</compile_context>

<pallas_src>
import functools

import jax
import jax.numpy as jnp
from jax.experimental import pallas as pl
from jax.experimental.pallas import tpu as pltpu


_LANE = 128
_SUBLANE = 8
_MIB = 1024 * 1024
_TARGET_BLOCK_BYTES = 4 * _MIB   # aim for ~1-4 MiB of input data per block
_NEG_INF = float("-inf")


def _tpu_params():
    """Return (physical VMEM bytes, True if chip has 2 TensorCores)."""
    vmem = 64 * _MIB            # conservative default (v7x-sized)
    two_core = False
    try:
        info = pltpu.get_tpu_info()
        vmem = int(getattr(info, "vmem_capacity_bytes", vmem))
    except Exception:
        pass
    try:
        kind = jax.devices()[0].device_kind.lower()
        two_core = any(t in kind for t in ("v7", "v4", "v5p"))
    except Exception:
        pass
    return vmem, two_core


def _fast_reciprocal(s):
    # EUP approximate reciprocal seed (free slot, same unit as exp) plus one
    # Newton-Raphson step on the VPU: essentially exact f32.
    r = pl.reciprocal(s, approx=True)
    return r * (2.0 - s * r)


# ----------------------------------------------------------------------------
# Path A: full reduced axis (N) resident per block, tiled over columns only.
# ----------------------------------------------------------------------------
def _softmax_dim0_kernel(x_ref, o_ref):
    # Whole (N, tile_d) column stripe is in VMEM; dim=0 reduction is local.
    x = x_ref[...].astype(jnp.float32)
    m = jnp.max(x, axis=0, keepdims=True)              # per-column max
    s = jnp.sum(jnp.exp(x - m), axis=0, keepdims=True)  # per-column normalizer
    inv = _fast_reciprocal(s)
    # exp(x - m) re-issued on the store; EUP has huge slack in a DMA-bound
    # kernel (the compiler may CSE it back into one temp, still within budget).
    o_ref[...] = (jnp.exp(x - m) * inv).astype(o_ref.dtype)


def _softmax_single_pass(x, *, tile_budget, vmem_limit, two_core):
    n, d = x.shape
    eb = x.dtype.itemsize
    lane_blocks = pl.cdiv(d, _LANE)

    # Per-element VMEM cost: double-buffered input + output DMA buffers plus
    # f32 temporaries for the stripe.
    per_elem = 2 * eb + 2 * eb + 8
    max_lb_vmem = max(1, tile_budget // (n * per_elem * _LANE))
    max_lb_data = max(1, _TARGET_BLOCK_BYTES // (n * eb * _LANE))
    tile_lb = max(1, min(lane_blocks, max_lb_vmem, max_lb_data))

    # Prefer >= 4 pipelined grid steps; >= 8 (and even) on 2-TensorCore chips
    # so each core gets pipelined work on the "parallel" axis.
    min_steps = 8 if two_core else 4
    if lane_blocks >= min_steps:
        tile_lb = min(tile_lb, max(1, lane_blocks // min_steps))

    grid_d = pl.cdiv(lane_blocks, tile_lb)
    if two_core and grid_d > 1 and grid_d % 2 == 1:
        grid_d += 1
    tile_lb = pl.cdiv(lane_blocks, grid_d)
    grid_d = pl.cdiv(lane_blocks, tile_lb)
    tile_d = tile_lb * _LANE

    # Ragged D handled by boundary blocks: columns are independent, so the
    # unspecified out-of-range lanes produce garbage that is never written
    # back (out-of-bounds output writes are dropped).
    return pl.pallas_call(
        _softmax_dim0_kernel,
        out_shape=jax.ShapeDtypeStruct((n, d), x.dtype),
        grid_spec=pltpu.PrefetchScalarGridSpec(
            num_scalar_prefetch=0,
            grid=(grid_d,),
            in_specs=[pl.BlockSpec((n, tile_d), lambda j: (0, j))],
            out_specs=pl.BlockSpec((n, tile_d), lambda j: (0, j)),
        ),
        compiler_params=pltpu.CompilerParams(
            dimension_semantics=("parallel",),
            vmem_limit_bytes=vmem_limit,
        ),
    )(x)


# ----------------------------------------------------------------------------
# Path B: N too large for a resident column stripe -> online two-pass softmax.
#   Pass 1: running per-column max / sum(exp) over an "arbitrary" N grid axis.
#   Pass 2: elementwise normalization (fully parallel grid).
# ----------------------------------------------------------------------------
def _colstats_kernel(x_ref, m_ref, s_ref, *, n_rows, tile_n):
    k = pl.program_id(1)

    @pl.when(k == 0)
    def _():
        m_ref[...] = jnp.full(m_ref.shape, _NEG_INF, jnp.float32)
        s_ref[...] = jnp.zeros(s_ref.shape, jnp.float32)

    x = x_ref[...].astype(jnp.float32)
    # Mask rows past N (boundary block on the reduction axis): they must not
    # contribute to the per-column max / sum.
    row = k * tile_n + jax.lax.broadcasted_iota(jnp.int32, x.shape, 0)
    valid = row < n_rows
    xm = jnp.where(valid, x, _NEG_INF)

    m_old = m_ref[...]
    m_new = jnp.maximum(m_old, jnp.max(xm, axis=0, keepdims=True))
    # Safe rescale: avoid exp(-inf - (-inf)) when a column has no data yet.
    alpha = jnp.where(m_new > m_old, jnp.exp(m_old - m_new), 1.0)
    e = jnp.where(valid, jnp.exp(xm - m_new), 0.0)
    s_ref[...] = alpha * s_ref[...] + jnp.sum(e, axis=0, keepdims=True)
    m_ref[...] = m_new


def _normalize_kernel(x_ref, m_ref, s_ref, o_ref):
    x = x_ref[...].astype(jnp.float32)
    e = jnp.exp(x - m_ref[...])
    o_ref[...] = (e * _fast_reciprocal(s_ref[...])).astype(o_ref.dtype)


def _softmax_two_pass(x, *, tile_budget, vmem_limit, two_core):
    del two_core  # both passes already expose a "parallel" column axis
    n, d = x.shape
    eb = x.dtype.itemsize
    lane_blocks = pl.cdiv(d, _LANE)
    row_blocks = pl.cdiv(n, _SUBLANE)

    # Lane tile shared by both passes (up to 512 lanes).
    tile_lb = max(1, min(lane_blocks, 4))
    tile_d = tile_lb * _LANE
    grid_d = pl.cdiv(lane_blocks, tile_lb)

    # Cap per-block input data around the DMA-efficiency target.
    cap_rb = max(1, (2 * _TARGET_BLOCK_BYTES) // (eb * tile_d * _SUBLANE))

    # Pass 1 streams only the input (plus one f32 temp); stats are tiny.
    per_elem1 = 2 * eb + 4
    tile_rb1 = max(1, min(row_blocks, cap_rb,
                          tile_budget // (per_elem1 * tile_d * _SUBLANE)))
    tile_n1 = tile_rb1 * _SUBLANE
    grid_n1 = pl.cdiv(row_blocks, tile_rb1)

    # Pass 2: double-buffered input + output blocks plus f32 temps.
    per_elem2 = 2 * eb + 2 * eb + 8
    tile_rb2 = max(1, min(row_blocks, cap_rb,
                          tile_budget // (per_elem2 * tile_d * _SUBLANE)))
    tile_n2 = tile_rb2 * _SUBLANE
    grid_n2 = pl.cdiv(row_blocks, tile_rb2)

    # Pass 1: per-column running max and sum(exp(x - max)).
    m, s = pl.pallas_call(
        functools.partial(_colstats_kernel, n_rows=n, tile_n=tile_n1),
        out_shape=(jax.ShapeDtypeStruct((1, d), jnp.float32),
                   jax.ShapeDtypeStruct((1, d), jnp.float32)),
        grid_spec=pltpu.PrefetchScalarGridSpec(
            num_scalar_prefetch=0,
            grid=(grid_d, grid_n1),                 # reduction axis (N) last
            in_specs=[pl.BlockSpec((tile_n1, tile_d), lambda j, k: (k, j))],
            out_specs=(pl.BlockSpec((1, tile_d), lambda j, k: (0, j)),
                       pl.BlockSpec((1, tile_d), lambda j, k: (0, j))),
        ),
        compiler_params=pltpu.CompilerParams(
            dimension_semantics=("parallel", "arbitrary"),
            vmem_limit_bytes=vmem_limit,
        ),
    )(x)

    # Pass 2: normalize (fully parallel; ragged boundary writes are dropped).
    out = pl.pallas_call(
        _normalize_kernel,
        out_shape=jax.ShapeDtypeStruct((n, d), x.dtype),
        grid_spec=pltpu.PrefetchScalarGridSpec(
            num_scalar_prefetch=0,
            grid=(grid_d, grid_n2),
            in_specs=[pl.BlockSpec((tile_n2, tile_d), lambda j, k: (k, j)),
                      pl.BlockSpec((1, tile_d), lambda j, k: (0, j)),
                      pl.BlockSpec((1, tile_d), lambda j, k: (0, j))],
            out_specs=pl.BlockSpec((tile_n2, tile_d), lambda j, k: (k, j)),
        ),
        compiler_params=pltpu.CompilerParams(
            dimension_semantics=("parallel", "parallel"),
            vmem_limit_bytes=vmem_limit,
        ),
    )(x, m, s)
    return out


# ----------------------------------------------------------------------------
# Public wrapper.
# ----------------------------------------------------------------------------
def softmax_dim0(x: jax.Array, *, vmem_budget_bytes: int | None = None):
    """Softmax over axis 0 (== F.softmax(x, dim=0)) computed in Pallas."""
    orig_shape = x.shape
    if x.ndim == 1:
        x2 = x.reshape(-1, 1)
    elif x.ndim == 2:
        x2 = x
    else:
        x2 = x.reshape(x.shape[0], -1)   # dim-0 softmax is columnwise

    n, d = x2.shape
    eb = x2.dtype.itemsize

    vmem, two_core = _tpu_params()
    # Generation-aware limits: ~96/88 MiB on 128-MiB chips, ~48/40 MiB on v7x.
    vmem_limit = max(48 * _MIB, min(vmem * 3 // 4, vmem - 16 * _MIB))
    tile_budget = (vmem_budget_bytes if vmem_budget_bytes is not None
                   else vmem_limit - 8 * _MIB)
    tile_budget = max(64 * 1024, int(tile_budget))

    # Per-column VMEM bytes if the full N extent is resident per block.
    per_col = n * (2 * eb + 2 * eb + 8)
    if tile_budget // per_col >= _LANE:
        out = _softmax_single_pass(x2, tile_budget=tile_budget,
                                   vmem_limit=vmem_limit, two_core=two_core)
    else:
        out = _softmax_two_pass(x2, tile_budget=tile_budget,
                                vmem_limit=vmem_limit, two_core=two_core)
    return out.reshape(orig_shape)


if __name__ == "__main__":
    key = jax.random.PRNGKey(0)
    k1, k2, k3, k4 = jax.random.split(key, 4)

    # 1) Basic shape implied by the module's forward (seq=8, hidden=128).
    x1 = jax.random.normal(k1, (8, 128), dtype=jnp.float32)
    o1 = jax.block_until_ready(softmax_dim0(x1))
    r1 = jax.nn.softmax(x1, axis=0)
    assert o1.shape == x1.shape and o1.dtype == x1.dtype
    assert jnp.allclose(o1, r1, atol=2e-4, rtol=2e-4)
    assert jnp.allclose(jnp.sum(o1, axis=0), 1.0, atol=1e-3)

    # 2) D not a multiple of 128 -> boundary-block (no pad/slice) path.
    x2 = jax.random.normal(k2, (16, 200), dtype=jnp.float32)
    o2 = jax.block_until_ready(softmax_dim0(x2))
    r2 = jax.nn.softmax(x2, axis=0)
    assert o2.shape == x2.shape and o2.dtype == x2.dtype
    assert jnp.allclose(o2, r2, atol=2e-4, rtol=2e-4)

    # 3) Two-pass (online) path, exercised by forcing a tiny VMEM budget.
    x3 = jax.random.normal(k3, (64, 200), dtype=jnp.float32)
    o3 = jax.block_until_ready(softmax_dim0(x3, vmem_budget_bytes=64 * 1024))
    r3 = jax.nn.softmax(x3, axis=0)
    assert o3.shape == x3.shape and o3.dtype == x3.dtype
    assert jnp.allclose(o3, r3, atol=2e-4, rtol=2e-4)
    assert jnp.allclose(jnp.sum(o3, axis=0), 1.0, atol=1e-3)

    # 4) Two-pass path with ragged N (exercises the in-kernel row mask).
    x4 = jax.random.normal(k4, (70, 200), dtype=jnp.float32)
    o4 = jax.block_until_ready(softmax_dim0(x4, vmem_budget_bytes=64 * 1024))
    r4 = jax.nn.softmax(x4, axis=0)
    assert o4.shape == x4.shape and o4.dtype == x4.dtype
    assert jnp.allclose(o4, r4, atol=2e-4, rtol=2e-4)

    print("KERNEL_OK")
</pallas_src>

<mosaic_0001>
module attributes {stable_mosaic.version = 11 : i64} {
  func.func @_softmax_dim0_kernel(%arg0: i32, %arg1: memref<8x128xf32, #tpu.memory_space<vmem>>, %arg2: memref<8x128xf32, #tpu.memory_space<vmem>>) attributes {dimension_semantics = [#tpu.dimension_semantics<parallel>], iteration_bounds = array<i64: 1>, scalar_prefetch = 0 : i64, scratch_operands = 0 : i64, tpu.core_type = #tpu.core_type<tc>, window_params = [{transform_indices = @transform_0, window_bounds = array<i64: 8, 128>}, {transform_indices = @transform_1, window_bounds = array<i64: 8, 128>}]} {
    %c0 = arith.constant 0 : index
    %c0_0 = arith.constant 0 : index
    %0 = vector.load %arg1[%c0, %c0_0] : memref<8x128xf32, #tpu.memory_space<vmem>>, vector<8x128xf32>
    %cst = arith.constant dense<0xFF800000> : vector<128xf32>
    %1 = vector.multi_reduction <maximumf>, %0, %cst [0] : vector<8x128xf32> to vector<128xf32>
    %2 = vector.shape_cast %1 : vector<128xf32> to vector<1x128xf32>
    %3 = vector.broadcast %2 : vector<1x128xf32> to vector<8x128xf32>
    %4 = arith.subf %0, %3 : vector<8x128xf32>
    %5 = math.exp %4 : vector<8x128xf32>
    %cst_1 = arith.constant dense<0.000000e+00> : vector<128xf32>
    %6 = vector.multi_reduction <add>, %5, %cst_1 [0] : vector<8x128xf32> to vector<128xf32>
    %7 = vector.shape_cast %6 : vector<128xf32> to vector<1x128xf32>
    %8 = tpu.reciprocal %7 {approx = true} : vector<1x128xf32> -> vector<1x128xf32>
    %9 = arith.mulf %7, %8 : vector<1x128xf32>
    %cst_2 = arith.constant 2.000000e+00 : f32
    %10 = vector.broadcast %cst_2 : f32 to vector<1x128xf32>
    %11 = arith.subf %10, %9 : vector<1x128xf32>
    %12 = arith.mulf %8, %11 : vector<1x128xf32>
    %13 = vector.broadcast %2 : vector<1x128xf32> to vector<8x128xf32>
    %14 = arith.subf %0, %13 : vector<8x128xf32>
    %15 = math.exp %14 : vector<8x128xf32>
    %16 = vector.broadcast %12 : vector<1x128xf32> to vector<8x128xf32>
    %17 = arith.mulf %15, %16 : vector<8x128xf32>
    %c0_3 = arith.constant 0 : index
    %c0_4 = arith.constant 0 : index
    %18 = vector.load %arg2[%c0_3, %c0_4] : memref<8x128xf32, #tpu.memory_space<vmem>>, vector<8x128xf32>
    tpu.vector_store %arg2[%c0_3, %c0_4], %17 {strides = array<i32>} : memref<8x128xf32, #tpu.memory_space<vmem>>, vector<8x128xf32>,
    return
  }
  func.func @transform_0(%arg0: i32) -> (i32, i32) {
    %c0_i32 = arith.constant 0 : i32
    %c0_i32_0 = arith.constant 0 : i32
    return %c0_i32, %arg0 : i32, i32
  }
  func.func @transform_1(%arg0: i32) -> (i32, i32) {
    %c0_i32 = arith.constant 0 : i32
    %c0_i32_0 = arith.constant 0 : i32
    return %c0_i32, %arg0 : i32, i32
  }
}

</mosaic_0001>

<bundles_post_ra>
// kernel: tpu_custom_call.1
= control target key start
LH: loop header
LB: loop body
LE: loop exit
PB: predicated region body
PF: predicated region fallthrough
CT: control target
= control target key end

     0   :  { %6 = vsyncpa [#allocation3], 0  ;;  %s148_s0 = inlined_call_operand.hbm [shape: f32[8,128], index: 0, kind: input, shape index: {}]   ;;  %s149_s1 = inlined_call_operand.hbm [shape: f32[8,128], index: 1, kind: output, shape index: {}]  }
   0x1   :  { %7 = vsyncpa [#allocation4], 0  ;;  %s112_s6 = smov [#allocation2]   ;;  %s64_s10 = scalar_lea.hbm %s148_s0, 128 }
   0x2   :  { %s14_s7 = sshll.u32 %s112_s6, 4  ;;  %p65_p0 = scmp.ne.s32.totalorder %s148_s0, %s64_s10  ;;  %s15_s7 = int_to_ptr.vmem [resolvable:$true] %s14_s7 }
   0x3   :  { %p68_p1 = scmp.lt.u32.totalorder %s64_s10, %s148_s0 }
   0x5   :  { %p70_p2 = pnand %p68_p1, %p65_p0 }
   0x7   :  { %73 = shalt.err (!%p70_p2)
}
   0x8   :  { %s74_s15 = scalar_lea.vmem %s15_s7, 128  ;;  %p79_p4 = scmp.lt.s32.totalorder %s15_s7, %s15_s7 }
   0x9   :  { %p75_p3 = scmp.ne.s32.totalorder %s15_s7, %s74_s15  ;;  %p80_p5 = scmp.lt.s32.totalorder %s74_s15, %s74_s15 }
   0xb   :  { %p81_p6 = por %p80_p5, %p79_p4 }
   0xd   :  { %p82_p7 = pnand %p81_p6, %p75_p3 }
   0xf   :  { %85 = shalt.err (!%p82_p7)
}
  0x10   :  { %17 = dma.hbm_to_vmem [thread:$0]  %s148_s0, 128, %s15_s7, [#allocation3]  }
  0x11   :  { %108 = dma.done.wait [#allocation3], 128  }
  0x12   :  { %109 = vsyncadd [#allocation3], 4294967168  ;;  %v21_v0 = vld [vmem:[#allocation2] sm:$0xff]  ;;  %s113_s0 = smov [#allocation5]  }
  0x13   :  { %v22_v1 = vrot.slane %v21_v0, 4  ;;  %s49_s18 = sshll.u32 %s113_s0, 4  ;;  %s50_s18 = int_to_ptr.vmem [resolvable:$true] %s49_s18 }
  0x14   :  { %s86_s19 = scalar_lea.vmem %s50_s18, 128  ;;  %p91_p9 = scmp.lt.s32.totalorder %s50_s18, %s50_s18 }
  0x15   :  { %v23_v2 = vmax.f32 %v21_v0, %v22_v1  ;;  %p87_p8 = scmp.ne.s32.totalorder %s50_s18, %s86_s19  ;;  %p92_p10 = scmp.lt.s32.totalorder %s86_s19, %s86_s19 }
  0x17   :  { %v24_v3 = vrot.slane %v23_v2, 2  ;;  %p93_p11 = por %p92_p10, %p91_p9 }
  0x19   :  { %v25_v4 = vmax.f32 %v23_v2, %v24_v3  ;;  %p94_p12 = pnand %p93_p11, %p87_p8 }
  0x1b   :  { %v26_v5 = vrot.slane %v25_v4, 1 }
  0x1d   :  { %v27_v6 = vmax.f32 %v25_v4, %v26_v5 }
  0x1f   :  { %v28_v7 = vsub.f32 %v21_v0, %v27_v6 }
  0x21   :  { %v29_v8 = vmul.f32 1.442695, %v28_v7 }
  0x23   :  { %60 = vpow2.f32 %v29_v8 }
  0x2d   :  { %v61_v9 = vpop.eup %60 }
  0x2e   :  { %v31_v10 = vrot.slane %v61_v9, 4 }
  0x30   :  { %v32_v11 = vadd.f32 %v61_v9, %v31_v10 }
  0x32   :  { %v33_v12 = vrot.slane %v32_v11, 2 }
  0x34   :  { %v34_v13 = vadd.f32 %v33_v12, %v32_v11 }
  0x36   :  { %v35_v14 = vrot.slane %v34_v13, 1 }
  0x38   :  { %v36_v15 = vadd.f32 %v35_v14, %v34_v13 }
  0x3a   :  { %62 = vrcp.f32 %v36_v15 }
  0x44   :  { %v63_v16 = vpop.eup %62 }
  0x45   :  { %v38_v17 = vmul.f32 %v63_v16, %v36_v15 }
  0x47   :  { %v39_v18 = vsub.f32 2.0, %v38_v17 }
  0x49   :  { %v40_v19 = vmul.f32 %v63_v16, %v39_v18 }
  0x4b   :  { %v41_v20 = vmul.f32 %v61_v9, %v40_v19 }
  0x4d   :  { %42 = vst [vmem:[#allocation5] sm:$0xff] %v41_v20 }
  0x4e   :  { %97 = shalt.err (!%p94_p12)
}
  0x4f   :  { %s98_s22 = scalar_lea.hbm %s149_s1, 128 }
  0x50   :  { %p99_p13 = scmp.ne.s32.totalorder %s149_s1, %s98_s22  ;;  %p102_p0 = scmp.lt.u32.totalorder %s98_s22, %s149_s1 }
  0x52   :  { %p104_p1 = pnand %p102_p0, %p99_p13 }
  0x54   :  { %107 = shalt.err (!%p104_p1)
}
  0x55   :  { %52 = dma.vmem_to_hbm [thread:$0]  %s50_s18, 128, %s149_s1, [#allocation4]  }
  0x56   :  { %110 = dma.done.wait [#allocation4], 128  }
  0x57   :  { %111 = vsyncadd [#allocation4], 4294967168 }
  0x58   :  { %56 = vsyncpa [#allocation3], 1 }
  0x59   :  { %57 = vsyncpa [#allocation4], 1 }

</bundles_post_ra>
